<compile_context>
chip_gen: v5e
topology: v5e:2x2
jax: 0.10.0
libtpu: 0.0.40
codegen_flags: <defaults>
</compile_context>

<pallas_src>
import math

import jax
import jax.numpy as jnp
from jax.experimental import pallas as pl
from jax.experimental.pallas import tpu as pltpu


def _token_embedding_kernel(x_ref, w_ref, o_ref):
    """Compute one (bb, L, tn) output block of the circular k=3 conv.

    x_ref: (bb, L, c_in)   -- bb batch elements
    w_ref: (3, c_in, tn)   -- w_ref[k][c, o] = W_torch[o, c, k] for this d tile
    o_ref: (bb, L, tn)
    """
    bb = x_ref.shape[0]
    seq = x_ref.shape[1]

    # Weight taps loaded once per grid step; stay live across the batch loop.
    w_prev = w_ref[0]   # multiplies x[(t-1) % L]
    w_cur = w_ref[1]    # multiplies x[t]
    w_next = w_ref[2]   # multiplies x[(t+1) % L]

    # Static unroll over the batch elements of this block: each iteration is a
    # small 2-D roll + three MXU dots, so vreg pressure stays tiny even for
    # long sequences.  The three taps are kept as three accumulating dots
    # (rather than one lane-concatenated K=3*c_in matmul): the kernel is
    # HBM-bound with large MXU slack, and this avoids an unaligned minor-dim
    # concatenate.
    for b in range(bb):
        xb = x_ref[b]                                    # (L, c_in)
        x_prev = pltpu.roll(xb, 1, axis=0)               # x[(t-1) % L]
        x_next = pltpu.roll(xb, seq - 1, axis=0)         # x[(t+1) % L]
        acc = jnp.dot(xb, w_cur, preferred_element_type=jnp.float32)
        acc = acc + jnp.dot(x_prev, w_prev, preferred_element_type=jnp.float32)
        acc = acc + jnp.dot(x_next, w_next, preferred_element_type=jnp.float32)
        o_ref[b] = acc.astype(o_ref.dtype)


def _pick_d_tile(d_model: int) -> int:
    """Largest multiple-of-128 tile that divides d_model (capped ~512), else full."""
    if d_model % 128 != 0 or d_model <= 512:
        return d_model
    for cand in (512, 384, 256, 128):
        if d_model % cand == 0:
            return cand
    return d_model


def _pick_batch_block(B: int, L: int, tn: int, itemsize: int, n_dtiles: int) -> int:
    """Largest divisor of B giving a <=4 MiB output block; keep a few grid steps."""
    target_bytes = 4 << 20          # ~1-4 MiB output blocks (fits v5e/v6e/v7x VMEM
    max_unroll = 32                 # budgets double-buffered, well under 32 MiB)
    divisors = [d for d in range(1, B + 1) if B % d == 0]
    bb = 1
    for d in divisors:
        if d <= max_unroll and d * L * tn * itemsize <= target_bytes:
            bb = d
    # Keep some grid steps for DMA/compute pipelining and 2-TC sharding (v7x).
    min_steps = min(4, B * n_dtiles)
    while bb > 1 and (B // bb) * n_dtiles < min_steps:
        bb = max(d for d in divisors if d < bb)
    return bb


def token_embedding(x: jax.Array, weight: jax.Array) -> jax.Array:
    """Pallas equivalent of TokenEmbedding.forward(x).

    x:      (B, L, c_in)
    weight: (d_model, c_in, 3)   -- PyTorch Conv1d weight layout
    Returns (B, L, d_model) in x.dtype.
    """
    B, L, c_in = x.shape
    d_model, c_in_w, ksize = weight.shape
    assert c_in_w == c_in and ksize == 3

    # w[k] = W[:, :, k].T with shape (c_in, d_model): ready for x @ w[k].
    w = jnp.transpose(weight, (2, 1, 0)).astype(x.dtype)          # (3, c_in, d_model)

    itemsize = jnp.dtype(x.dtype).itemsize
    tn = _pick_d_tile(d_model)
    n_dtiles = d_model // tn
    bb = _pick_batch_block(B, L, tn, itemsize, n_dtiles)
    n_bblocks = B // bb
    grid = (n_dtiles, n_bblocks)   # d_model tiles OUTER -> weight stays VMEM-resident

    cost = pl.CostEstimate(
        flops=2 * 3 * B * L * c_in * d_model,
        transcendentals=0,
        bytes_accessed=(n_dtiles * B * L * c_in      # x re-read once per d tile
                        + 3 * c_in * d_model         # weight, each tile fetched once
                        + B * L * d_model            # output written once
                        ) * itemsize,
    )

    return pl.pallas_call(
        _token_embedding_kernel,
        out_shape=jax.ShapeDtypeStruct((B, L, d_model), x.dtype),
        grid_spec=pltpu.PrefetchScalarGridSpec(
            num_scalar_prefetch=0,
            grid=grid,
            in_specs=[
                pl.BlockSpec((bb, L, c_in), lambda j, i: (i, 0, 0)),
                pl.BlockSpec((3, c_in, tn), lambda j, i: (0, 0, j)),
            ],
            out_specs=pl.BlockSpec((bb, L, tn), lambda j, i: (i, 0, j)),
        ),
        compiler_params=pltpu.CompilerParams(
            dimension_semantics=("parallel", "parallel"),
            vmem_limit_bytes=32 * 1024 * 1024,
        ),
        cost_estimate=cost,
    )(x, w)


def kaiming_conv1d_weight(key, c_in, d_model, ksize=3):
    """Matches nn.init.kaiming_normal_(mode='fan_in', nonlinearity='leaky_relu')."""
    fan_in = c_in * ksize
    gain = math.sqrt(2.0 / (1.0 + 0.01 ** 2))     # leaky_relu, default slope 0.01
    std = gain / math.sqrt(fan_in)
    return std * jax.random.normal(key, (d_model, c_in, ksize), dtype=jnp.float32)


def _reference_token_embedding(x, weight):
    """Pure-JAX reference: circular pad + valid conv, mirroring the PyTorch code."""
    x_t = jnp.transpose(x, (0, 2, 1))                              # (B, c_in, L)
    x_pad = jnp.pad(x_t, ((0, 0), (0, 0), (1, 1)), mode="wrap")    # circular pad=1
    y = jax.lax.conv_general_dilated(
        x_pad, weight, window_strides=(1,), padding="VALID",
        dimension_numbers=("NCH", "OIH", "NCH"),
        precision=jax.lax.Precision.HIGHEST,
        preferred_element_type=jnp.float32)
    return jnp.transpose(y, (0, 2, 1))                             # (B, L, d_model)


if __name__ == "__main__":
    batch, seq_len, c_in, d_model = 2, 16, 4, 32

    key = jax.random.PRNGKey(0)
    kx, kw = jax.random.split(key)
    x = jax.random.normal(kx, (batch, seq_len, c_in), dtype=jnp.float32)
    weight = kaiming_conv1d_weight(kw, c_in, d_model)

    out = token_embedding(x, weight)
    out = jax.block_until_ready(out)

    ref = _reference_token_embedding(x, weight)
    assert out.shape == (batch, seq_len, d_model), out.shape
    assert out.dtype == jnp.float32
    err = float(jnp.max(jnp.abs(out - ref)))
    assert jnp.allclose(out, ref, atol=1e-2, rtol=1e-2), err

    print("KERNEL_OK")
</pallas_src>

<mosaic_0001>
module attributes {stable_mosaic.version = 11 : i64} {
  func.func @_token_embedding_kernel(%arg0: i32, %arg1: i32, %arg2: memref<1x16x4xf32, #tpu.memory_space<vmem>>, %arg3: memref<3x4x32xf32, #tpu.memory_space<vmem>>, %arg4: memref<1x16x32xf32, #tpu.memory_space<vmem>>) attributes {dimension_semantics = [#tpu.dimension_semantics<parallel>, #tpu.dimension_semantics<parallel>], iteration_bounds = array<i64: 1, 2>, scalar_prefetch = 0 : i64, scratch_operands = 0 : i64, tpu.core_type = #tpu.core_type<tc>, window_params = [{transform_indices = @transform_0, window_bounds = array<i64: 1, 16, 4>}, {transform_indices = @transform_1, window_bounds = array<i64: 3, 4, 32>}, {transform_indices = @transform_2, window_bounds = array<i64: 1, 16, 32>}]} {
    %c0 = arith.constant 0 : index
    %c0_0 = arith.constant 0 : index
    %c0_1 = arith.constant 0 : index
    %0 = vector.load %arg3[%c0, %c0_0, %c0_1] : memref<3x4x32xf32, #tpu.memory_space<vmem>>, vector<1x4x32xf32>
    %1 = vector.shape_cast %0 : vector<1x4x32xf32> to vector<4x32xf32>
    %c1 = arith.constant 1 : index
    %c0_2 = arith.constant 0 : index
    %c0_3 = arith.constant 0 : index
    %2 = vector.load %arg3[%c1, %c0_2, %c0_3] : memref<3x4x32xf32, #tpu.memory_space<vmem>>, vector<1x4x32xf32>
    %3 = vector.shape_cast %2 : vector<1x4x32xf32> to vector<4x32xf32>
    %c2 = arith.constant 2 : index
    %c0_4 = arith.constant 0 : index
    %c0_5 = arith.constant 0 : index
    %4 = vector.load %arg3[%c2, %c0_4, %c0_5] : memref<3x4x32xf32, #tpu.memory_space<vmem>>, vector<1x4x32xf32>
    %5 = vector.shape_cast %4 : vector<1x4x32xf32> to vector<4x32xf32>
    %c0_6 = arith.constant 0 : index
    %c0_7 = arith.constant 0 : index
    %c0_8 = arith.constant 0 : index
    %6 = vector.load %arg2[%c0_6, %c0_7, %c0_8] : memref<1x16x4xf32, #tpu.memory_space<vmem>>, vector<1x16x4xf32>
    %7 = vector.shape_cast %6 : vector<1x16x4xf32> to vector<16x4xf32>
    %c1_i32 = arith.constant 1 : i32
    %8 = tpu.dynamic_rotate %7 by %c1_i32 dim 0 : vector<16x4xf32>, i32 -> vector<16x4xf32>
    %c15_i32 = arith.constant 15 : i32
    %9 = tpu.dynamic_rotate %7 by %c15_i32 dim 0 : vector<16x4xf32>, i32 -> vector<16x4xf32>
    %cst = arith.constant dense<0.000000e+00> : vector<16x32xf32>
    %10 = tpu.matmul %7, %3, %cst {dimension_numbers = #tpu.dot_dimension_numbers<[1], [0], [0], [1], [0, 0, 1, 1], [], []>} : vector<16x4xf32>, vector<4x32xf32>, vector<16x32xf32> -> vector<16x32xf32>
    %cst_9 = arith.constant dense<0.000000e+00> : vector<16x32xf32>
    %11 = tpu.matmul %8, %1, %cst_9 {dimension_numbers = #tpu.dot_dimension_numbers<[1], [0], [0], [1], [0, 0, 1, 1], [], []>} : vector<16x4xf32>, vector<4x32xf32>, vector<16x32xf32> -> vector<16x32xf32>
    %12 = arith.addf %10, %11 : vector<16x32xf32>
    %cst_10 = arith.constant dense<0.000000e+00> : vector<16x32xf32>
    %13 = tpu.matmul %9, %5, %cst_10 {dimension_numbers = #tpu.dot_dimension_numbers<[1], [0], [0], [1], [0, 0, 1, 1], [], []>} : vector<16x4xf32>, vector<4x32xf32>, vector<16x32xf32> -> vector<16x32xf32>
    %14 = arith.addf %12, %13 : vector<16x32xf32>
    %c0_11 = arith.constant 0 : index
    %c0_12 = arith.constant 0 : index
    %c0_13 = arith.constant 0 : index
    %15 = vector.load %arg4[%c0_11, %c0_12, %c0_13] : memref<1x16x32xf32, #tpu.memory_space<vmem>>, vector<1x16x32xf32>
    %16 = vector.shape_cast %15 : vector<1x16x32xf32> to vector<16x32xf32>
    %17 = vector.shape_cast %14 : vector<16x32xf32> to vector<1x16x32xf32>
    tpu.vector_store %arg4[%c0_11, %c0_12, %c0_13], %17 {strides = array<i32>} : memref<1x16x32xf32, #tpu.memory_space<vmem>>, vector<1x16x32xf32>,
    return
  }
  func.func @transform_0(%arg0: i32, %arg1: i32) -> (i32, i32, i32) {
    %c0_i32 = arith.constant 0 : i32
    %c0_i32_0 = arith.constant 0 : i32
    %c0_i32_1 = arith.constant 0 : i32
    return %arg1, %c0_i32, %c0_i32_0 : i32, i32, i32
  }
  func.func @transform_1(%arg0: i32, %arg1: i32) -> (i32, i32, i32) {
    %c0_i32 = arith.constant 0 : i32
    %c0_i32_0 = arith.constant 0 : i32
    %c0_i32_1 = arith.constant 0 : i32
    return %c0_i32, %c0_i32_0, %arg0 : i32, i32, i32
  }
  func.func @transform_2(%arg0: i32, %arg1: i32) -> (i32, i32, i32) {
    %c0_i32 = arith.constant 0 : i32
    %c0_i32_0 = arith.constant 0 : i32
    return %arg1, %c0_i32, %arg0 : i32, i32, i32
  }
}

</mosaic_0001>

<bundles_post_ra>
// kernel: tpu_custom_call.1
= control target key start
LH: loop header
LB: loop body
LE: loop exit
PB: predicated region body
PF: predicated region fallthrough
CT: control target
= control target key end

     0   :  { %7 = vsyncpa [#allocation3], 0  ;;  %s687_s0 = inlined_call_operand.vmem [shape: f32[2,16,4], index: 0, kind: input, shape index: {}]   ;;  %s688_s1 = inlined_call_operand.vmem [shape: f32[3,4,32], index: 1, kind: input, shape index: {}]   ;;  %s689_s2 = inlined_call_operand.hbm [shape: f32[2,16,32], index: 2, kind: output, shape index: {}]  }
   0x1   :  { %9 = vsyncpa [#allocation3 + $0x1], 0  ;;  %s581_s9 = smov 0   ;;  %s583_s10 = smov 0  }
   0x2   :  { %s585_s11 = smov 0   ;;  %s587_s12 = smov 0  }
   0x3   :  { %s589_s13 = smov 0   ;;  %s591_s14 = smov 0  }
   0x4 LB: > { %s399_s15 = sadd.s32 4294967295, %s562_s14   ;;  %s400_s16 = sadd.s32 4294967294, %s562_s14   ;;  %s562_s14 = sphi %s591_s14, %s15_s14   ;;  %s558_s13 = sphi %s589_s13, %s696_s13   ;;  %s554_s12 = sphi %s587_s12, %s695_s12   ;;  %s550_s11 = sphi %s585_s11, %s694_s11   ;;  %s546_s10 = sphi %s583_s10, %s693_s10   ;;  %s542_s9 = sphi %s581_s9, %s692_s9  }
   0x5   : > { %s24_s17 = sadd.s32 1, %s558_s13  ;;  %s88_s18 = sadd.s32 1, %s550_s11 }
   0x6   : > { %p25_p0 = scmp.ge.s32.totalorder %s24_s17, 2  ;;  %p98_p1 = scmp.ne.s32.totalorder %s550_s11, %s546_s10 }
   0x7   : > { %p99_p2 = scmp.eq.s32.totalorder %s399_s15, 1  ;;  %p104_p3 = scmp.ne.s32.totalorder %s546_s10, %s542_s9 }
   0x8   : > { %s698_s17 = smov (%p25_p0, %s24_s17), 0  ;;  %p105_p5 = scmp.eq.s32.totalorder %s400_s16, 1 }
   0x9   : > { %p621_p4 = por %p99_p2, %p98_p1  ;;  %s83_s20 = ssub.s32 %s558_s13, %s698_s17 }
   0xa   : > { %p404_p6 = scmp.ge.s32.totalorder %s562_s14, 1  ;;  %p86_p7 = scmp.eq.s32.totalorder %s83_s20, 0 }
   0xb   : > { %p628_p8 = por %p105_p5, %p104_p3  ;;  %p138_p9 = scmp.lt.s32.totalorder %s562_s14, 3 }
   0xc   : > { %s634_s22 = scalar_select %p86_p7, %s550_s11, %s88_s18  }
   0xd   : > { %p139_p10 = pnand %p404_p6, %p138_p9 }
   0xe   : > { %p164_p11 = scmp.lt.s32.totalorder (!%p139_p10), %s554_s12, 1  ;;  %s161_s6 = sand.u32 (!%p139_p10), 1, %s546_s10  }
   0xf   : > { %142 = sbr.rel (%p139_p10) target bundleno = 174 (0xae), region = 28  ;;  %s405_s7 = sshll.u32 (!%p139_p10), %s161_s6, 4 }
  0x10   : > { %s425_s8 = sshll.u32 (!%p139_p10), %s554_s12, 4  ;;  %s163_s20 = scalar_lea.vmem (!%p139_p10), [#allocation2], %s405_s7 }
  0x11   : > { %s308_s18 = scalar_lea.hbm (!%p139_p10), %s689_s2, %s425_s8  ;;  %s309_s23 = sshll.u32 (!%p139_p10), %s163_s20, 4  ;;  %s310_s23 = int_to_ptr.vmem [resolvable:$true] %s309_s23 }
  0x12   : > { %s311_s24 = sshll.u32 (!%p139_p10), %s308_s18, 4  ;;  %s312_s24 = int_to_ptr.hbm [resolvable:$true] %s311_s24 }
  0x13   : > { %s498_s25 = sshra.s32 (!%p139_p10), %s312_s24, 4  ;;  %s499_s25 = int_to_ptr.hbm [resolvable:$true] %s498_s25 }
  0x14   : > { %v409_v0 = vld [vmem:[%s688_s1 + $0x8] sm:$0xf]  ;;  %vm199_vm0 = vcmask 1043456   ;;  %v182_v1 = vlaneseq  ;;  %v173_v2 = vld [vmem:[%s688_s1] sm:$0xf]  ;;  %s165_s29 = scalar_select %p164_p11, %s554_s12, 1 }
  0x15   : > { %416 = vmatpush.msk.msra.mxu2 %vm199_vm0, %v409_v0  ;;  %v408_v3 = vld [vmem:[%s688_s1 + $0x4] sm:$0xf]  ;;  %410 = vmatpush.msk.msra.mxu0 %vm199_vm0, %v173_v2  ;;  %vm192_vm2 = vcmask 31744   ;;  %vm292_vm4 = vcmask 261120   ;;  %s296_s12 = scalar_lea.sflag [#allocation3], %s161_s6  ;;  %s500_s26 = scalar_lea.hbm %s499_s25, 16 }
  0x16   : > { %v183_v4 = vshrl.u32 %v182_v1, 7  ;;  %413 = vmatpush.msk.msra.mxu1 %vm199_vm0, %v408_v3  ;;  %426 = vmatpush.msk.msra.mxu3 %vm199_vm0, %v173_v2  ;;  %s424_s30 = sshll.u32 %s165_s29, 4  ;;  %p501_p12 = scmp.ne.s32.totalorder %s499_s25, %s500_s26 }
  0x17   : > { %s168_s5 = scalar_lea.vmem %s687_s0, %s424_s30  ;;  %s504_s29 = scalar_lea.hbm %s689_s2, 32 }
  0x18   : > { %v178_v5 = vld [vmem:[%s168_s5] sm:$0xff]  ;;  %v179_v6 = vld [vmem:[%s168_s5 + $0x8] sm:$0xff]  ;;  %vm189_vm1 = vcmp.lt.s32.totalorder %v183_v4, 7  ;;  %vm184_vm3 = vcmp.lt.s32.totalorder %v183_v4, 1  ;;  %p502_p13 = pnand %p501_p12, %p621_p4  ;;  %p505_p1 = scmp.lt.s32.totalorder %s499_s25, %s689_s2 }
  0x19   : > { %v187_v7 = vrot.slane %v178_v5, 1  ;;  %v188_v8 = vrot.slane %v179_v6, 1  ;;  %v180_v9 = vrot.slane %v178_v5, 7  ;;  %v181_v10 = vrot.slane %v179_v6, 7  ;;  %414 = vmatmul.msk.f32.vlgmr.msra.gmra.mxu1 %vm192_vm2, %v178_v5  ;;  %p506_p2 = scmp.lt.s32.totalorder %s504_s29, %s500_s26 }
  0x1a   : > { %p503_p0 = pneg %p502_p13 }
  0x1b   : > { %v190_v11 = vsel %vm189_vm1, %v187_v7, %v188_v8  ;;  %v186_v12 = vsel %vm184_vm3, %v181_v10, %v180_v9  ;;  %v185_v13 = vsel %vm184_vm3, %v180_v9, %v181_v10  ;;  %v191_v14 = vsel %vm189_vm1, %v188_v8, %v187_v7  ;;  %p507_p3 = por %p506_p2, %p505_p1 }
  0x1c   : > { %417 = vmatmul.msk.f32.vlgmr.msra.gmra.mxu2 %vm192_vm2, %v190_v11  ;;  %411 = vmatmul.msk.f32.vlgmr.msra.gmra.mxu0 %vm192_vm2, %v186_v12 }
  0x1d   : > { %412 = vmatmul.msk.f32.vlgmr.msra.gmra.mxu3 %vm192_vm2, %v185_v13  ;;  %p508_p5 = pnand %p507_p3, %p503_p0 }
  0x21   : > { %415 = vmatmul.msk.f32.gmra.mxu1 %vm192_vm2, %v179_v6 }
  0x24   : > { %418 = vmatmul.msk.f32.gmra.mxu2 %vm192_vm2, %v191_v14 }
  0x96   : > { %v252_v15 = vpop.f32.mrf.mxu1 }
  0x99   : > { %v220_v16 = vpop.f32.mrf.mxu0 }
  0x9a   : > { %v253_v17 = vadd.f32 %v252_v15, %v220_v16 }
  0x9e   : > { %v255_v21 = vpop.f32.mrf.mxu1 }
  0x9f   : > { %v284_v18 = vpop.f32.mrf.mxu2 }
  0xa0   : > { %v290_v19 = vadd.f32 %v284_v18, %v253_v17  ;;  %v223_v20 = vpop.f32.mrf.mxu3 }
  0xa1   : > { %v256_v22 = vadd.f32 %v255_v21, %v223_v20 }
  0xa2   : > { %293 = vst.msk [vmem:[%s163_s20] sm:$0xff] %vm292_vm4, %v290_v19 }
  0xa7   : > { %v287_v23 = vpop.f32.mrf.mxu2 }
  0xa8   : > { %v291_v24 = vadd.f32 %v287_v23, %v256_v22 }
  0xaa   : > { %294 = vst.msk [vmem:[%s163_s20 + $0x8] sm:$0xff] %vm292_vm4, %v291_v24 }
  0xab   : > { %511 = shalt.err (!%p508_p5)
}
  0xac   : > { %s564_s4 = smov 128   ;;  %s565_s5 = smov 8  }
  0xad   : > { %427 = dma.vmem_to_hbm [thread:$0]  (%p621_p4), %s310_s23, 256, %s312_s24, %s296_s12, %s564_s4, %s564_s4, %s565_s5  }
  0xae PF: > { %p433_p6 = scmp.ge.s32.totalorder %s562_s14, 2  ;;  %s326_s6 = sand.u32 1, %s542_s9  }
  0xaf   : > { %s327_s7 = scalar_lea.sflag [#allocation3], %s326_s6 }
  0xb0   : > { %p430_p7 = pnand %p433_p6, %p628_p8 }
  0xb2   : > { %p431_p9 = pneg %p430_p7 }
  0xb4   : > { %537 = dma.done.wait (%p431_p9), %s327_s7, 256  }
  0xb5   : > { %539 = vsyncadd (%p431_p9), %s327_s7, 4294967040  ;;  %s15_s14 = sadd.s32 1, %s562_s14   ;;  %s692_s9 = smov %s546_s10 }
  0xb6   : > { %p12_p10 = scmp.ge.s32.totalorder %s15_s14, 4   ;;  %s693_s10 = smov %s550_s11 }
  0xb7   : > { %s694_s11 = smov %s634_s22  ;;  %s695_s12 = smov %s558_s13 }
  0xb8   : > { %s696_s13 = smov %s698_s17  ;;  %14 = sbr.rel (!%p12_p10) target bundleno = 4 (0x4), region = 68 }
  0xbd   :  { %333 = vsyncpa [#allocation3], 1 }
  0xbe   :  { %335 = vsyncpa [#allocation3 + $0x1], 1 }

</bundles_post_ra>
